<compile_context>
chip_gen: v7x
topology: tpu7x:2x2x1
jax: 0.10.0
libtpu: 0.0.40
codegen_flags: <defaults>
</compile_context>

<pallas_src>
import functools

import jax
import jax.numpy as jnp
from jax import lax
from jax.experimental import pallas as pl
from jax.experimental.pallas import tpu as pltpu


def _focal_kernel(x_ref, t_ref, a_ref, out_ref, *,
                  gamma, int_gamma, C, Rb, S, needs_mask, per_voxel):
    t = t_ref[0]                                                 # (Rb, 128) int32
    xs = [x_ref[0, c].astype(jnp.float32) for c in range(C)]    # C x (Rb, 128) f32

    # Class-axis max over full (Rb, 128) slabs (short static loop, C is small).
    m = xs[0]
    for c in range(1, C):
        m = jnp.maximum(m, xs[c])

    sum_e = jnp.zeros_like(m)
    e_t = jnp.zeros_like(m)       # exp(x - m) gathered at the target class
    x_t = jnp.zeros_like(m)       # logit gathered at the target class
    alpha_t = jnp.zeros_like(m)   # alpha gathered at the target class
    for c in range(C):
        e_c = jnp.exp(xs[c] - m)
        sum_e = sum_e + e_c
        is_c = t == c
        e_t = jnp.where(is_c, e_c, e_t)
        x_t = jnp.where(is_c, xs[c], x_t)
        alpha_t = jnp.where(is_c, a_ref[c], alpha_t)             # SMEM scalar select

    log_p = (x_t - m) - jnp.log(sum_e)                           # log prob of target class
    probs = e_t / sum_e                                          # reuse exp; no second exp pass

    one_m = 1.0 - probs
    if int_gamma is not None:
        if int_gamma == 0:
            w = jnp.ones_like(one_m)
        else:
            w = one_m
            for _ in range(int_gamma - 1):                       # cheap VPU multiplies
                w = w * one_m
    else:
        # Non-integer gamma: (1-p)**g = exp(g*log(1-p)); guard (1-p)==0 -> 0.
        w = jnp.where(one_m > 0.0,
                      jnp.exp(jnp.float32(gamma) *
                              jnp.log(jnp.maximum(one_m, 1e-30))),
                      0.0)

    loss = -alpha_t * w * log_p                                  # (Rb, 128)

    if per_voxel:
        out_ref[0, 0] = loss
        return

    if needs_mask:
        # Zero voxels past the real spatial extent (wrapper zero-pad + Pallas partial-block
        # garbage).  Select does not propagate NaN/Inf from the unselected lanes.
        sb = pl.program_id(1)
        row = lax.broadcasted_iota(jnp.int32, (Rb, 128), 0)
        lane = lax.broadcasted_iota(jnp.int32, (Rb, 128), 1)
        valid = (sb * Rb + row) * 128 + lane < S
        loss = jnp.where(valid, loss, 0.0)

    if Rb % 8 == 0:
        # Fold rows into one (8, 128) slab; wrapper sums the tiny partials.
        out_ref[0, 0] = jnp.sum(loss.reshape(Rb // 8, 8, 128), axis=0)
    else:
        # Tiny-volume fallback (Rb == R < 8): scalar partial into position [0, 0].
        part = jnp.sum(loss)
        ri = lax.broadcasted_iota(jnp.int32, (8, 128), 0)
        ci = lax.broadcasted_iota(jnp.int32, (8, 128), 1)
        out_ref[0, 0] = jnp.where((ri == 0) & (ci == 0), part, 0.0)


def multi_ce_focal_loss(predict, target, alpha, *, gamma=2.0, reduction="mean",
                        block_rows=None):
    """predict: (N, C, D, H, W) float; target: (N, D, H, W) int; alpha: (C,) float."""
    N, C, D, H, W = predict.shape
    S = D * H * W

    x = predict.reshape(N, C, S)                 # free reshape, no NCDHW transpose
    t = target.reshape(N, S)
    if t.dtype != jnp.int32:
        t = t.astype(jnp.int32)
    a = jnp.asarray(alpha, jnp.float32).reshape(C)

    R = -(-S // 128)                             # ceil(S / 128)
    S_pad = R * 128
    if S_pad != S:                               # only ragged volumes pay this extra pass
        x = jnp.pad(x, ((0, 0), (0, 0), (0, S_pad - S)))
        t = jnp.pad(t, ((0, 0), (0, S_pad - S)))
    x = x.reshape(N, C, R, 128)                  # spatial fills sublanes + lanes densely
    t = t.reshape(N, R, 128)

    if block_rows is None:
        # ~4 MiB of logits per block: amortizes ~0.35us/step overhead to <10%.
        block_rows = max(8, ((4 << 20) // (C * 128 * x.dtype.itemsize)) // 8 * 8)
    if R >= 8:
        Rb = min(block_rows, (R // 8) * 8)       # multiple of 8, <= R
    else:
        Rb = R                                   # tiny volume: single full-extent block
    if N == 1 and R >= 16:
        # v7x has 2 TensorCores; make sure a single-sample call still has >= 2 blocks.
        half = (((R + 1) // 2) + 7) // 8 * 8
        Rb = min(Rb, half)
    nsr = -(-R // Rb)

    per_voxel = (reduction == "none")
    needs_mask = (not per_voxel) and (nsr * Rb * 128 != S)

    g = float(gamma)
    int_gamma = int(g) if (g.is_integer() and 0 <= g <= 8) else None

    kernel = functools.partial(_focal_kernel, gamma=g, int_gamma=int_gamma, C=C,
                               Rb=Rb, S=S, needs_mask=needs_mask, per_voxel=per_voxel)

    out_rows = Rb if per_voxel else 8
    out_shape = jax.ShapeDtypeStruct((N, nsr, out_rows, 128), jnp.float32)

    x_blk = C * Rb * 128 * x.dtype.itemsize
    t_blk = Rb * 128 * 4
    o_blk = out_rows * 128 * 4
    vmem_limit = int(min(48 << 20,                       # stays under v7x's 64 MiB physical
                         2 * (x_blk + t_blk + o_blk)     # double-buffered I/O
                         + (C + 16) * Rb * 512           # f32 working set
                         + (8 << 20)))                   # headroom

    out = pl.pallas_call(
        kernel,
        out_shape=out_shape,
        grid_spec=pltpu.PrefetchScalarGridSpec(
            num_scalar_prefetch=0,
            grid=(N, nsr),
            in_specs=[
                pl.BlockSpec((1, C, Rb, 128), lambda n, s: (n, 0, s, 0)),   # logits block
                pl.BlockSpec((1, Rb, 128), lambda n, s: (n, s, 0)),         # targets block
                pl.BlockSpec(memory_space=pltpu.MemorySpace.SMEM),          # alpha scalars
            ],
            out_specs=pl.BlockSpec((1, 1, out_rows, 128), lambda n, s: (n, s, 0, 0)),
        ),
        compiler_params=pltpu.CompilerParams(
            dimension_semantics=("parallel", "parallel"),
            vmem_limit_bytes=vmem_limit),
    )(x, t, a)

    if per_voxel:
        # PyTorch reduction='none': per-voxel loss, flattened (N*D*H*W, 1).
        return out.reshape(N, nsr * Rb * 128)[:, :S].reshape(-1, 1)

    loss_sum = jnp.sum(out)
    if reduction == "mean":
        return loss_sum / (N * S)
    elif reduction == "sum":
        return loss_sum
    else:
        raise ValueError(f"unsupported reduction: {reduction!r}")


def _reference(predict, target, alpha, gamma=2.0, reduction="mean"):
    # Pure-JAX reference matching the PyTorch forward.
    pt = jax.nn.softmax(predict, axis=1)                                  # (N,C,D,H,W)
    onehot = jax.nn.one_hot(target, predict.shape[1], dtype=pt.dtype)     # (N,D,H,W,C)
    class_mask = jnp.transpose(onehot, (0, 4, 1, 2, 3))                   # (N,C,D,H,W)
    probs = jnp.sum(pt * class_mask, axis=1).reshape(-1, 1)
    alpha_t = jnp.asarray(alpha)[target.reshape(-1)].reshape(-1, 1)
    log_p = jnp.log(probs)
    loss = -alpha_t * jnp.power(1.0 - probs, gamma) * log_p
    if reduction == "mean":
        return jnp.mean(loss)
    if reduction == "sum":
        return jnp.sum(loss)
    return loss


if __name__ == "__main__":
    key = jax.random.PRNGKey(0)
    ks = jax.random.split(key, 8)

    # Test 1: aligned small volume (S = 512, R = 4 < 8 -> full-extent block fallback), mean.
    N, C, D, H, W = 2, 4, 8, 8, 8
    predict = jax.random.normal(ks[0], (N, C, D, H, W), dtype=jnp.float32)
    target = jax.random.randint(ks[1], (N, D, H, W), 0, C, dtype=jnp.int32)
    alpha = (jnp.arange(C, dtype=jnp.float32) + 1.0) / C
    out = jax.block_until_ready(multi_ce_focal_loss(predict, target, alpha, gamma=2.0))
    ref = _reference(predict, target, alpha, gamma=2.0)
    assert jnp.allclose(out, ref, rtol=2e-5, atol=1e-6), (out, ref)

    # Test 2: ragged volume (S = 210, padded to 256) + non-integer gamma (power path).
    p2 = jax.random.normal(ks[2], (1, 3, 5, 6, 7), dtype=jnp.float32)
    t2 = jax.random.randint(ks[3], (1, 5, 6, 7), 0, 3, dtype=jnp.int32)
    a2 = (jnp.arange(3, dtype=jnp.float32) + 1.0) / 3
    out2 = jax.block_until_ready(
        multi_ce_focal_loss(p2, t2, a2, gamma=1.5, reduction="mean"))
    ref2 = _reference(p2, t2, a2, gamma=1.5, reduction="mean")
    assert jnp.allclose(out2, ref2, rtol=1e-4, atol=1e-6), (out2, ref2)

    # Test 3: dense multi-block path (S = 2048 -> R = 16, Rb = 8, two spatial blocks), sum.
    p3 = jax.random.normal(ks[4], (1, 4, 16, 16, 8), dtype=jnp.float32)
    t3 = jax.random.randint(ks[5], (1, 16, 16, 8), 0, 4, dtype=jnp.int32)
    a3 = (jnp.arange(4, dtype=jnp.float32) + 1.0) / 4
    out3 = jax.block_until_ready(
        multi_ce_focal_loss(p3, t3, a3, gamma=2.0, reduction="sum"))
    ref3 = _reference(p3, t3, a3, gamma=2.0, reduction="sum")
    assert jnp.allclose(out3, ref3, rtol=2e-5, atol=1e-4), (out3, ref3)

    # Test 4: ragged multi-block (S = 1170 -> R = 10, Rb = 8): the last block reads
    # Pallas-padded garbage rows; the final select must zero them.
    p4 = jax.random.normal(ks[6], (1, 3, 9, 10, 13), dtype=jnp.float32)
    t4 = jax.random.randint(ks[7], (1, 9, 10, 13), 0, 3, dtype=jnp.int32)
    a4 = jnp.array([0.25, 0.5, 0.25], dtype=jnp.float32)
    out4 = jax.block_until_ready(multi_ce_focal_loss(p4, t4, a4, gamma=2.0))
    ref4 = _reference(p4, t4, a4, gamma=2.0)
    assert jnp.allclose(out4, ref4, rtol=2e-5, atol=1e-6), (out4, ref4)

    # Test 5: reduction='none' (per-voxel losses, shape (N*D*H*W, 1)).
    out5 = jax.block_until_ready(
        multi_ce_focal_loss(predict, target, alpha, gamma=2.0, reduction="none"))
    ref5 = _reference(predict, target, alpha, gamma=2.0, reduction="none")
    assert out5.shape == ref5.shape, (out5.shape, ref5.shape)
    assert jnp.allclose(out5, ref5, rtol=2e-5, atol=1e-6), "reduction='none' mismatch"

    print("KERNEL_OK")
</pallas_src>

<mosaic_0001>
module attributes {stable_mosaic.version = 11 : i64} {
  func.func @_focal_kernel(%arg0: i32, %arg1: i32, %arg2: memref<1x4x4x128xf32, #tpu.memory_space<vmem>>, %arg3: memref<1x4x128xi32, #tpu.memory_space<vmem>>, %arg4: memref<4xf32, #tpu.memory_space<smem>>, %arg5: memref<1x1x8x128xf32, #tpu.memory_space<vmem>>) attributes {dimension_semantics = [#tpu.dimension_semantics<parallel>, #tpu.dimension_semantics<parallel>], iteration_bounds = array<i64: 2, 1>, scalar_prefetch = 0 : i64, scratch_operands = 0 : i64, tpu.core_type = #tpu.core_type<tc>, window_params = [{transform_indices = @transform_0, window_bounds = array<i64: 1, 4, 4, 128>}, {transform_indices = @transform_1, window_bounds = array<i64: 1, 4, 128>}, {transform_indices = @transform_2, window_bounds = array<i64: 4>}, {transform_indices = @transform_3, window_bounds = array<i64: 1, 1, 8, 128>}]} {
    %c0 = arith.constant 0 : index
    %c0_0 = arith.constant 0 : index
    %c0_1 = arith.constant 0 : index
    %0 = vector.load %arg3[%c0, %c0_0, %c0_1] : memref<1x4x128xi32, #tpu.memory_space<vmem>>, vector<1x4x128xi32>
    %1 = vector.shape_cast %0 : vector<1x4x128xi32> to vector<4x128xi32>
    %c0_2 = arith.constant 0 : index
    %c0_3 = arith.constant 0 : index
    %c0_4 = arith.constant 0 : index
    %c0_5 = arith.constant 0 : index
    %2 = vector.load %arg2[%c0_2, %c0_3, %c0_4, %c0_5] : memref<1x4x4x128xf32, #tpu.memory_space<vmem>>, vector<1x1x4x128xf32>
    %3 = vector.shape_cast %2 : vector<1x1x4x128xf32> to vector<4x128xf32>
    %c0_6 = arith.constant 0 : index
    %c1 = arith.constant 1 : index
    %c0_7 = arith.constant 0 : index
    %c0_8 = arith.constant 0 : index
    %4 = vector.load %arg2[%c0_6, %c1, %c0_7, %c0_8] : memref<1x4x4x128xf32, #tpu.memory_space<vmem>>, vector<1x1x4x128xf32>
    %5 = vector.shape_cast %4 : vector<1x1x4x128xf32> to vector<4x128xf32>
    %c0_9 = arith.constant 0 : index
    %c2 = arith.constant 2 : index
    %c0_10 = arith.constant 0 : index
    %c0_11 = arith.constant 0 : index
    %6 = vector.load %arg2[%c0_9, %c2, %c0_10, %c0_11] : memref<1x4x4x128xf32, #tpu.memory_space<vmem>>, vector<1x1x4x128xf32>
    %7 = vector.shape_cast %6 : vector<1x1x4x128xf32> to vector<4x128xf32>
    %c0_12 = arith.constant 0 : index
    %c3 = arith.constant 3 : index
    %c0_13 = arith.constant 0 : index
    %c0_14 = arith.constant 0 : index
    %8 = vector.load %arg2[%c0_12, %c3, %c0_13, %c0_14] : memref<1x4x4x128xf32, #tpu.memory_space<vmem>>, vector<1x1x4x128xf32>
    %9 = vector.shape_cast %8 : vector<1x1x4x128xf32> to vector<4x128xf32>
    %10 = arith.maximumf %3, %5 : vector<4x128xf32>
    %11 = arith.maximumf %10, %7 : vector<4x128xf32>
    %12 = arith.maximumf %11, %9 : vector<4x128xf32>
    %cst = arith.constant 0.000000e+00 : f32
    %13 = vector.broadcast %cst : f32 to vector<4x128xf32>
    %cst_15 = arith.constant 0.000000e+00 : f32
    %14 = vector.broadcast %cst_15 : f32 to vector<4x128xf32>
    %cst_16 = arith.constant 0.000000e+00 : f32
    %15 = vector.broadcast %cst_16 : f32 to vector<4x128xf32>
    %cst_17 = arith.constant 0.000000e+00 : f32
    %16 = vector.broadcast %cst_17 : f32 to vector<4x128xf32>
    %17 = arith.subf %3, %12 : vector<4x128xf32>
    %18 = math.exp %17 : vector<4x128xf32>
    %19 = arith.addf %13, %18 : vector<4x128xf32>
    %c0_i32 = arith.constant 0 : i32
    %20 = vector.broadcast %c0_i32 : i32 to vector<4x128xi32>
    %21 = arith.cmpi eq, %1, %20 : vector<4x128xi32>
    %22 = arith.select %21, %18, %14 : vector<4x128xi1>, vector<4x128xf32>
    %23 = arith.select %21, %3, %15 : vector<4x128xi1>, vector<4x128xf32>
    %c0_18 = arith.constant 0 : index
    %24 = memref.load %arg4[%c0_18] : memref<4xf32, #tpu.memory_space<smem>>
    %25 = vector.broadcast %24 : f32 to vector<4x128xf32>
    %26 = arith.select %21, %25, %16 : vector<4x128xi1>, vector<4x128xf32>
    %27 = arith.subf %5, %12 : vector<4x128xf32>
    %28 = math.exp %27 : vector<4x128xf32>
    %29 = arith.addf %19, %28 : vector<4x128xf32>
    %c1_i32 = arith.constant 1 : i32
    %30 = vector.broadcast %c1_i32 : i32 to vector<4x128xi32>
    %31 = arith.cmpi eq, %1, %30 : vector<4x128xi32>
    %32 = arith.select %31, %28, %22 : vector<4x128xi1>, vector<4x128xf32>
    %33 = arith.select %31, %5, %23 : vector<4x128xi1>, vector<4x128xf32>
    %c1_19 = arith.constant 1 : index
    %34 = memref.load %arg4[%c1_19] : memref<4xf32, #tpu.memory_space<smem>>
    %35 = vector.broadcast %34 : f32 to vector<4x128xf32>
    %36 = arith.select %31, %35, %26 : vector<4x128xi1>, vector<4x128xf32>
    %37 = arith.subf %7, %12 : vector<4x128xf32>
    %38 = math.exp %37 : vector<4x128xf32>
    %39 = arith.addf %29, %38 : vector<4x128xf32>
    %c2_i32 = arith.constant 2 : i32
    %40 = vector.broadcast %c2_i32 : i32 to vector<4x128xi32>
    %41 = arith.cmpi eq, %1, %40 : vector<4x128xi32>
    %42 = arith.select %41, %38, %32 : vector<4x128xi1>, vector<4x128xf32>
    %43 = arith.select %41, %7, %33 : vector<4x128xi1>, vector<4x128xf32>
    %c2_20 = arith.constant 2 : index
    %44 = memref.load %arg4[%c2_20] : memref<4xf32, #tpu.memory_space<smem>>
    %45 = vector.broadcast %44 : f32 to vector<4x128xf32>
    %46 = arith.select %41, %45, %36 : vector<4x128xi1>, vector<4x128xf32>
    %47 = arith.subf %9, %12 : vector<4x128xf32>
    %48 = math.exp %47 : vector<4x128xf32>
    %49 = arith.addf %39, %48 : vector<4x128xf32>
    %c3_i32 = arith.constant 3 : i32
    %50 = vector.broadcast %c3_i32 : i32 to vector<4x128xi32>
    %51 = arith.cmpi eq, %1, %50 : vector<4x128xi32>
    %52 = arith.select %51, %48, %42 : vector<4x128xi1>, vector<4x128xf32>
    %53 = arith.select %51, %9, %43 : vector<4x128xi1>, vector<4x128xf32>
    %c3_21 = arith.constant 3 : index
    %54 = memref.load %arg4[%c3_21] : memref<4xf32, #tpu.memory_space<smem>>
    %55 = vector.broadcast %54 : f32 to vector<4x128xf32>
    %56 = arith.select %51, %55, %46 : vector<4x128xi1>, vector<4x128xf32>
    %57 = arith.subf %53, %12 : vector<4x128xf32>
    %58 = math.log %49 : vector<4x128xf32>
    %59 = arith.subf %57, %58 : vector<4x128xf32>
    %60 = arith.divf %52, %49 : vector<4x128xf32>
    %cst_22 = arith.constant 1.000000e+00 : f32
    %61 = vector.broadcast %cst_22 : f32 to vector<4x128xf32>
    %62 = arith.subf %61, %60 : vector<4x128xf32>
    %63 = arith.mulf %62, %62 : vector<4x128xf32>
    %cst_23 = arith.constant 0.000000e+00 : f32
    %64 = vector.broadcast %cst_23 : f32 to vector<4x128xf32>
    %65 = arith.subf %64, %56 : vector<4x128xf32>
    %66 = arith.mulf %65, %63 : vector<4x128xf32>
    %67 = arith.mulf %66, %59 : vector<4x128xf32>
    %68 = vector.shape_cast %67 : vector<4x128xf32> to vector<1x4x128xf32>
    %cst_24 = arith.constant dense<0.000000e+00> : vector<1xf32>
    %69 = vector.multi_reduction <add>, %68, %cst_24 [1, 2] : vector<1x4x128xf32> to vector<1xf32>
    %70 = vector.shape_cast %69 : vector<1xf32> to vector<1x1x1xf32>
    %71 = vector.extract %70[0, 0, 0] : f32 from vector<1x1x1xf32>
    %72 = tpu.iota {dimensions = array<i32: 0>} : vector<8x128xi32>
    %73 = tpu.iota {dimensions = array<i32: 1>} : vector<8x128xi32>
    %c0_i32_25 = arith.constant 0 : i32
    %74 = vector.broadcast %c0_i32_25 : i32 to vector<8x128xi32>
    %75 = arith.cmpi eq, %72, %74 : vector<8x128xi32>
    %c0_i32_26 = arith.constant 0 : i32
    %76 = vector.broadcast %c0_i32_26 : i32 to vector<8x128xi32>
    %77 = arith.cmpi eq, %73, %76 : vector<8x128xi32>
    %78 = arith.andi %75, %77 : vector<8x128xi1>
    %cst_27 = arith.constant 0.000000e+00 : f32
    %79 = vector.broadcast %71 : f32 to vector<8x128xf32>
    %80 = vector.broadcast %cst_27 : f32 to vector<8x128xf32>
    %81 = arith.select %78, %79, %80 : vector<8x128xi1>, vector<8x128xf32>
    %c0_28 = arith.constant 0 : index
    %c0_29 = arith.constant 0 : index
    %c0_30 = arith.constant 0 : index
    %c0_31 = arith.constant 0 : index
    %82 = vector.load %arg5[%c0_28, %c0_29, %c0_30, %c0_31] : memref<1x1x8x128xf32, #tpu.memory_space<vmem>>, vector<1x1x8x128xf32>
    %83 = vector.shape_cast %82 : vector<1x1x8x128xf32> to vector<8x128xf32>
    %84 = vector.shape_cast %81 : vector<8x128xf32> to vector<1x1x8x128xf32>
    tpu.vector_store %arg5[%c0_28, %c0_29, %c0_30, %c0_31], %84 {strides = array<i32>} : memref<1x1x8x128xf32, #tpu.memory_space<vmem>>, vector<1x1x8x128xf32>,
    return
  }
  func.func @transform_0(%arg0: i32, %arg1: i32) -> (i32, i32, i32, i32) {
    %c0_i32 = arith.constant 0 : i32
    %c0_i32_0 = arith.constant 0 : i32
    %c0_i32_1 = arith.constant 0 : i32
    return %arg0, %c0_i32, %arg1, %c0_i32_0 : i32, i32, i32, i32
  }
  func.func @transform_1(%arg0: i32, %arg1: i32) -> (i32, i32, i32) {
    %c0_i32 = arith.constant 0 : i32
    %c0_i32_0 = arith.constant 0 : i32
    return %arg0, %arg1, %c0_i32 : i32, i32, i32
  }
  func.func @transform_2(%arg0: i32, %arg1: i32) -> i32 {
    %c0_i32 = arith.constant 0 : i32
    %c0_i32_0 = arith.constant 0 : i32
    return %c0_i32 : i32
  }
  func.func @transform_3(%arg0: i32, %arg1: i32) -> (i32, i32, i32, i32) {
    %c0_i32 = arith.constant 0 : i32
    %c0_i32_0 = arith.constant 0 : i32
    %c0_i32_1 = arith.constant 0 : i32
    return %arg0, %arg1, %c0_i32, %c0_i32_0 : i32, i32, i32, i32
  }
}

</mosaic_0001>

<bundles_post_ra>
// kernel: tpu_custom_call.1
= control target key start
LH: loop header
LB: loop body
LE: loop exit
PB: predicated region body
PF: predicated region fallthrough
CT: control target
= control target key end

     0   :  { %s1035_s0 = inlined_call_operand.hbm [shape: f32[2,4,4,128], index: 0, kind: input, shape index: {}]   ;;  %s1036_s1 = inlined_call_operand.hbm [shape: s32[2,4,128], index: 1, kind: input, shape index: {}]   ;;  %s1037_s2 = inlined_call_operand.vmem [shape: f32[4], index: 2, kind: input, shape index: {}]   ;;  %s1038_s3 = inlined_call_operand.hbm [shape: f32[2,1,8,128], index: 3, kind: output, shape index: {}]  }
   0x1   :  { %1044 = sst [smem:[#allocation14_spill]] %s1035_s0 }
   0x2   :  { %1045 = sst [smem:[#allocation15_spill]] %s1037_s2 }
   0x3   :  { %8 = vsyncpa [#allocation3], 0 }
   0x4   :  { %10 = vsyncpa [#allocation3 + $0x1], 0 }
   0x5   :  { %11 = vsyncpa [#allocation7], 0 }
   0x6   :  { %13 = vsyncpa [#allocation7 + $0x1], 0 }
   0x7   :  { %14 = vsyncpa [#allocation5], 0 }
   0x8   :  { %15 = vsyncpa [#allocation4], 0 }
   0x9   :  { %17 = vsyncpa [#allocation4 + $0x1], 0  ;;  %s788_s12 = smov 0   ;;  %s790_s13 = smov 0  }
   0xa   :  { %s792_s14 = smov 0   ;;  %s794_s15 = smov 0  }
   0xb   :  { %s796_s16 = smov 0   ;;  %s798_s17 = smov 0  }
   0xc LB: > { %s475_s18 = sadd.s32 4294967295, %s760_s17   ;;  %s476_s19 = sadd.s32 4294967294, %s760_s17   ;;  %s760_s17 = sphi %s798_s17, %s23_s17   ;;  %s756_s16 = sphi %s796_s16, %s1067_s16   ;;  %s752_s15 = sphi %s794_s15, %s1066_s15   ;;  %s748_s14 = sphi %s792_s14, %s1065_s14   ;;  %s744_s13 = sphi %s790_s13, %s1064_s13   ;;  %s740_s12 = sphi %s788_s12, %s1063_s12  }
   0xd   : > { %s44_s20 = sadd.s32 1, %s748_s14  ;;  %p51_p0 = scmp.ne.s32.totalorder %s748_s14, %s744_s13 }
   0xe   : > { %p52_p1 = scmp.eq.s32.totalorder %s760_s17, 0  ;;  %p57_p2 = scmp.ne.s32.totalorder %s744_s13, %s740_s12 }
   0xf   : > { %p826_p3 = scmp.eq.s32.totalorder %s475_s18, 0  ;;  %p132_p4 = scmp.eq.s32.totalorder %s475_s18, 1 }
  0x10   : > { %p830_p5 = por %p52_p1, %p51_p0  ;;  %p138_p6 = scmp.eq.s32.totalorder %s476_s19, 1 }
  0x11   : > { %s1046_s21 = scalar_select %p826_p3, 1, 0 }
  0x12   : > { %p836_p7 = por %p826_p3, %p57_p2  ;;  %p840_p8 = por %p132_p4, %p51_p0 }
  0x13   : > { %p844_p9 = por %p138_p6, %p57_p2  ;;  %p477_p10 = scmp.ge.s32.totalorder %s760_s17, 1 }
  0x14   : > { %s1048_s23 = scalar_select %p836_p7, 1, 0 }
  0x15   : > { %s1049_s24 = scalar_select %p840_p8, 1, 0 }
  0x16   : > { %s1050_s25 = scalar_select %p844_p9, 1, 0 }
  0x17   : > { %p145_p11 = scmp.lt.s32.totalorder %s760_s17, 3  ;;  %s1051_s2 = sld [smem:[#allocation15_spill]] }
  0x18   : > { %p529_p0 = scmp.lt.s32.totalorder %s760_s17, 2  ;;  %s35_s5 = sadd.s32 1, %s756_s16 }
  0x19   : > { %p853_p12 = pnand %p477_p10, %p145_p11  ;;  %p874_p6 = scmp.ge.s32.totalorder %s35_s5, 2 }
  0x1a   : > { %p863_p2 = pnand %p529_p0, %p830_p5  ;;  %s879_s7 = sand.u32 1, %s748_s14  }
  0x1b   : > { %s1052_s29 = scalar_select %p853_p12, 1, 0 }
  0x1c   : > { %p513_p1 = pneg %p853_p12 }
  0x1d   : > { %s158_s28 = sshll.u32 %s1051_s2, 4  ;;  %s159_s28 = int_to_ptr.vmem [resolvable:$true] %s158_s28 }
  0x1e   : > { %p869_p4 = pnand %p513_p1, %p826_p3  ;;  %s595_s8 = scalar_lea.vmem %s159_s28, 16 }
  0x1f   : > { %p596_p10 = scmp.ne.s32.totalorder %s159_s28, %s595_s8  ;;  %p603_p13 = scmp.lt.s32.totalorder %s159_s28, %s159_s28 }
  0x20   : > { %p597_p5 = pneg %p869_p4  ;;  %p604_p9 = scmp.lt.s32.totalorder %s595_s8, %s595_s8 }
  0x22   : > { %p598_p11 = pnand %p597_p5, %p596_p10  ;;  %p605_p1 = por %p604_p9, %p603_p13 }
  0x24   : > { %p599_p0 = pneg %p598_p11 }
  0x26   : > { %p606_p8 = pnand %p605_p1, %p599_p0 }
  0x28   : > { %609 = shalt.err (!%p606_p8)
}
  0x29   : > { %s762_s9 = smov [#allocation8]   ;;  %s1069_s5 = smov (%p874_p6, %s35_s5), 0 }
  0x2a   : > { %516 = dma.vmem_to_smem (!%p869_p4), %s159_s28, 16, %s762_s9, [#allocation5]  }
  0x2b   : > { %s480_s10 = sshll.u32 %s879_s7, 4  ;;  %s39_s11 = ssub.s32 %s756_s16, %s1069_s5 }
  0x2c   : > { %p42_p8 = scmp.eq.s32.totalorder %s39_s11, 0  ;;  %s500_s18 = sshll.u32 %s756_s16, 8 }
  0x2d   : > { %s1056_s0 = sld [smem:[#allocation14_spill]]  ;;  %s173_s27 = scalar_lea.vmem [#allocation2], %s480_s10 }
  0x2e   : > { %s181_s4 = sshll.u32 %s173_s27, 4  ;;  %s170_s6 = scalar_lea.sflag [#allocation3], %s879_s7  ;;  %s903_s4 = int_to_ptr.vmem [resolvable:$true] %s181_s4 }
  0x2f   : > { %s901_s28 = scalar_select %p42_p8, %s748_s14, %s44_s20  }
  0x30   : > { %p612_p13 = pneg %p863_p2 }
  0x33   : > { %s896_s26 = scalar_lea.hbm %s1056_s0, %s500_s18  ;;  %s615_s18 = scalar_lea.hbm %s1056_s0, 512 }
  0x34   : > { %s610_s8 = scalar_lea.hbm %s896_s26, 256  ;;  %p616_p10 = scmp.lt.u32.totalorder %s896_s26, %s1056_s0 }
  0x35   : > { %p611_p9 = scmp.ne.s32.totalorder %s896_s26, %s610_s8  ;;  %p617_p5 = scmp.lt.u32.totalorder %s615_s18, %s610_s8 }
  0x36   : > { %p619_p0 = scmp.lt.u32.totalorder %s610_s8, %s896_s26 }
  0x37   : > { %p613_p4 = pnand %p612_p13, %p611_p9  ;;  %p618_p11 = por %p617_p5, %p616_p10 }
  0x39   : > { %p614_p6 = pneg %p613_p4  ;;  %p620_p1 = por %p619_p0, %p618_p11 }
  0x3b   : > { %p621_p8 = pnand %p620_p1, %p614_p6 }
  0x3d   : > { %624 = shalt.err (!%p621_p8)
}
  0x3e   : > { %s625_s20 = scalar_lea.vmem %s903_s4, 256  ;;  %s763_s22 = smov [#allocation2]  }
  0x3f   : > { %p626_p9 = scmp.ne.s32.totalorder %s903_s4, %s625_s20  ;;  %s630_s27 = sshll.u32 %s763_s22, 4  ;;  %s631_s27 = int_to_ptr.vmem [resolvable:$false] %s630_s27 }
  0x40   : > { %s632_s9 = scalar_lea.vmem %s631_s27, 512  ;;  %p633_p7 = scmp.lt.s32.totalorder %s903_s4, %s631_s27 }
  0x41   : > { %p628_p4 = pnand %p626_p9, %p612_p13  ;;  %p634_p10 = scmp.lt.s32.totalorder %s632_s9, %s625_s20 }
  0x43   : > { %p629_p3 = pneg %p628_p4  ;;  %p635_p5 = por %p634_p10, %p633_p7 }
  0x45   : > { %p636_p11 = pnand %p635_p5, %p629_p3 }
  0x47   : > { %639 = shalt.err (!%p636_p11)
}
  0x48   : > { %s764_s8 = smov 64   ;;  %s765_s11 = smov 4  }
  0x49   : > { %520 = dma.hbm_to_vmem [thread:$0]  (!%p863_p2), %s896_s26, 256, %s903_s4, %s170_s6, %s764_s8, %s764_s8, %s765_s11  }
  0x4a   : > { %s483_s18 = sshll.u32 %s879_s7, 2  ;;  %s484_s10 = sshll.u32 %s756_s16, 6 }
  0x4b   : > { %s938_s22 = scalar_lea.hbm %s1036_s1, %s484_s10  ;;  %s195_s27 = scalar_lea.vmem [#allocation6], %s483_s18 }
  0x4c   : > { %s203_s9 = sshll.u32 %s195_s27, 4  ;;  %s192_s0 = scalar_lea.sflag [#allocation7], %s879_s7  ;;  %s204_s9 = int_to_ptr.vmem [resolvable:$true] %s203_s9 }
  0x4d   : > { %s640_s2 = scalar_lea.hbm %s938_s22, 64  ;;  %s645_s6 = scalar_lea.hbm %s1036_s1, 128 }
  0x4e   : > { %p641_p3 = scmp.ne.s32.totalorder %s938_s22, %s640_s2  ;;  %p646_p0 = scmp.lt.u32.totalorder %s938_s22, %s1036_s1 }
  0x4f   : > { %p647_p1 = scmp.lt.u32.totalorder %s645_s6, %s640_s2  ;;  %p649_p9 = scmp.lt.u32.totalorder %s640_s2, %s938_s22 }
  0x50   : > { %p643_p7 = pnand %p641_p3, %p612_p13 }
  0x51   : > { %p648_p8 = por %p647_p1, %p646_p0 }
  0x52   : > { %p644_p6 = pneg %p643_p7 }
  0x53   : > { %p650_p4 = por %p649_p9, %p648_p8 }
  0x55   : > { %p651_p10 = pnand %p650_p4, %p644_p6 }
  0x57   : > { %654 = shalt.err (!%p651_p10)
}
  0x58   : > { %s655_s7 = scalar_lea.vmem %s204_s9, 64  ;;  %s766_s18 = smov [#allocation6]  }
  0x59   : > { %p656_p5 = scmp.ne.s32.totalorder %s204_s9, %s655_s7  ;;  %s660_s10 = sshll.u32 %s766_s18, 4  ;;  %s661_s10 = int_to_ptr.vmem [resolvable:$false] %s660_s10 }
  0x5a   : > { %s662_s19 = scalar_lea.vmem %s661_s10, 128  ;;  %p663_p7 = scmp.lt.s32.totalorder %s204_s9, %s661_s10 }
  0x5b   : > { %p658_p11 = pnand %p656_p5, %p612_p13  ;;  %p664_p12 = scmp.lt.s32.totalorder %s662_s19, %s655_s7 }
  0x5d   : > { %p659_p3 = pneg %p658_p11  ;;  %p665_p0 = por %p664_p12, %p663_p7 }
  0x5f   : > { %p666_p1 = pnand %p665_p0, %p659_p3 }
  0x61   : > { %669 = shalt.err (!%p666_p1)
}
  0x62   : > { %523 = dma.hbm_to_vmem [thread:$0]  (!%p863_p2), %s938_s22, 64, %s204_s9, %s192_s0  }
  0x63   : > { %p1057_p6 = scmp.ne.s32.totalorder %s1052_s29, 0 }
  0x64   : > { %s963_s2 = sand.u32 (!%p1057_p6), 1, %s744_s13   ;;  %p1058_p13 = scmp.ne.s32.totalorder (!%p1057_p6), %s1048_s23, 0 }
  0x65   : > { %212 = sbr.rel (%p1057_p6) target bundleno = 389 (0x185), region = 32  ;;  %s486_s20 = sshll.u32 (!%p1057_p6), %s963_s2, 4 }
  0x66   : > { %s215_s27 = scalar_lea.sflag (!%p1057_p6), [#allocation3], %s963_s2  ;;  %s218_s26 = scalar_lea.vmem (!%p1057_p6), [#allocation2], %s486_s20 }
  0x6c   : > { %723 = dma.done.wait (%p1058_p13), %s215_s27, 256  }
  0x6d   : > { %725 = vsyncadd (%p1058_p13), %s215_s27, 4294967040  ;;  %s487_s0 = sshll.u32 %s963_s2, 2  ;;  %s224_s29 = scalar_lea.sflag [#allocation7], %s963_s2 }
  0x6e   : > { %s227_s30 = scalar_lea.vmem [#allocation6], %s487_s0 }
  0x6f   : > { %727 = dma.done.wait (%p1058_p13), %s224_s29, 64  }
  0x70   : > { %729 = vsyncadd (%p1058_p13), %s224_s29, 4294967232  ;;  %p1059_p12 = scmp.ne.s32.totalorder %s1046_s21, 0 }
  0x72   : > { %731 = dma.done.wait (%p1059_p12), [#allocation5], 16  }
  0x73   : > { %733 = vsyncadd (%p1059_p12), [#allocation5], 4294967280 }
  0x74   : > { %236 = sfence }
  0x75   : > { %v261_v0 = vld [vmem:[%s218_s26] sm:$0xf]  ;;  %v490_v1 = vld [vmem:[%s218_s26 + $0x4] sm:$0xf]  ;;  %v491_v2 = vld [vmem:[%s218_s26 + $0x8] sm:$0xf]  ;;  %v333_v58 = vlaneseq }
  0x76   : > { %v268_v3 = vmax.f32 %v261_v0, %v490_v1  ;;  %v492_v4 = vld [vmem:[%s218_s26 + $0xc] sm:$0xf]  ;;  %s278_s21 = sld [smem:[#allocation8]]  ;;  %v260_v18 = vld [vmem:[%s227_s30] sm:$0xf]  ;;  %s493_s23 = sld [smem:[#allocation8 + $0x1]] }
  0x77   : > { %vm275_vm0 = vcmp.eq.s32.totalorder %v260_v18, 0  ;;  %s494_s22 = sld [smem:[#allocation8 + $0x2]]  ;;  %vm285_vm1 = vcmp.eq.s32.totalorder %v260_v18, 1  ;;  %s495_s9 = sld [smem:[#allocation8 + $0x3]]  ;;  %vm295_vm2 = vcmp.eq.s32.totalorder %v260_v18, 2  ;;  %vm305_vm3 = vcmp.eq.s32.totalorder %v260_v18, 3 }
  0x78   : > { %v269_v5 = vmax.f32 %v268_v3, %v491_v2  ;;  %v277_v25 = vsel %vm275_vm0, %v261_v0, 0.0  ;;  %vm322_vm4 = vcmask 1043456   ;;  %s489_s4 = sshll.u32 %s963_s2, 3  ;;  %v334_v59 = vshrl.u32 %v333_v58, 7  ;;  %s497_s6 = sshll.u32 %s752_s15, 7 }
  0x79   : > { %v287_v29 = vsel %vm285_vm1, %v490_v1, %v277_v25  ;;  %v336_v60 = vand.u32 127, %v333_v58  ;;  %s259_s8 = scalar_lea.vmem [#allocation9], %s489_s4  ;;  %s986_s19 = scalar_lea.hbm %s1038_s3, %s497_s6 }
  0x7a   : > { %v270_v6 = vmax.f32 %v269_v5, %v492_v4  ;;  %v297_v33 = vsel %vm295_vm2, %v491_v2, %v287_v29  ;;  %vm337_vm5 = vcmp.eq.s32.totalorder %v334_v59, 0  ;;  %s358_s11 = sshll.u32 %s259_s8, 4  ;;  %s344_s20 = scalar_lea.sflag [#allocation4], %s963_s2  ;;  %s988_s11 = int_to_ptr.vmem [resolvable:$true] %s358_s11 }
  0x7b   : > { %v307_v37 = vsel %vm305_vm3, %v492_v4, %v297_v33  ;;  %vm338_vm6 = vcmp.eq.s32.totalorder %v336_v60, 0  ;;  %s670_s27 = scalar_lea.vmem %s988_s11, 128  ;;  %p1060_p8 = scmp.ne.s32.totalorder %s1049_s24, 0 }
  0x7c   : > { %v271_v7 = vsub.f32 %v261_v0, %v270_v6  ;;  %v281_v8 = vsub.f32 %v490_v1, %v270_v6  ;;  %v291_v9 = vsub.f32 %v491_v2, %v270_v6  ;;  %v301_v10 = vsub.f32 %v492_v4, %v270_v6  ;;  %vm339_vm7 = vmand %vm337_vm5, %vm338_vm6  ;;  %p671_p2 = scmp.ne.s32.totalorder %s988_s11, %s670_s27  ;;  %s767_s15 = smov [#allocation9]  }
  0x7d   : > { %v279_v23 = vstv %s278_s21  ;;  %v289_v27 = vstv %s493_s23  ;;  %v299_v31 = vstv %s494_s22  ;;  %v309_v35 = vstv %s495_s9  ;;  %s674_s26 = sshll.u32 %s767_s15, 4  ;;  %s675_s26 = int_to_ptr.vmem [resolvable:$false] %s674_s26 }
  0x7e   : > { %v272_v11 = vmul.f32 1.442695, %v271_v7  ;;  %v282_v12 = vmul.f32 1.442695, %v281_v8  ;;  %v292_v13 = vmul.f32 1.442695, %v291_v9  ;;  %v311_v41 = vsub.f32 %v307_v37, %v270_v6  ;;  %p672_p9 = pnand %p671_p2, %p1060_p8  ;;  %p677_p10 = scmp.lt.s32.totalorder %s988_s11, %s675_s26 }
  0x7f   : > { %v302_v14 = vmul.f32 1.442695, %v301_v10  ;;  %v280_v26 = vsel %vm275_vm0, %v279_v23, 0.0  ;;  %s676_s0 = scalar_lea.vmem %s675_s26, 256 }
  0x80   : > { %583 = vpow2.f32 %v272_v11  ;;  %v290_v30 = vsel %vm285_vm1, %v289_v27, %v280_v26  ;;  %p673_p4 = pneg %p672_p9  ;;  %p678_p5 = scmp.lt.s32.totalorder %s676_s0, %s670_s27 }
  0x81   : > { %585 = vpow2.f32 %v282_v12  ;;  %v300_v34 = vsel %vm295_vm2, %v299_v31, %v290_v30 }
  0x82   : > { %587 = vpow2.f32 %v292_v13  ;;  %v310_v40 = vsel %vm305_vm3, %v309_v35, %v300_v34  ;;  %p679_p11 = por %p678_p5, %p677_p10 }
  0x83   : > { %589 = vpow2.f32 %v302_v14  ;;  %v319_v45 = vsub.f32 0.0, %v310_v40 }
  0x84   : > { %p680_p3 = pnand %p679_p11, %p673_p4 }
  0x8a   : > { %v584_v15 = vpop.eup %583 }
  0x8b   : > { %v586_v16 = vpop.eup %585  ;;  %v276_v24 = vsel %vm275_vm0, %v584_v15, 0.0 }
  0x8c   : > { %v588_v17 = vpop.eup %587  ;;  %v284_v19 = vadd.f32 %v586_v16, %v584_v15  ;;  %v286_v28 = vsel %vm285_vm1, %v586_v16, %v276_v24 }
  0x8d   : > { %v590_v20 = vpop.eup %589  ;;  %v296_v32 = vsel %vm295_vm2, %v588_v17, %v286_v28 }
  0x8e   : > { %v294_v21 = vadd.f32 %v588_v17, %v284_v19  ;;  %v306_v36 = vsel %vm305_vm3, %v590_v20, %v296_v32 }
  0x90   : > { %v304_v22 = vadd.f32 %v590_v20, %v294_v21 }
  0x92   : > { %591 = vlog2.f32 %v304_v22 }
  0x93   : > { %593 = vrcp.f32 %v304_v22 }
  0x9c   : > { %v592_v38 = vpop.eup %591 }
  0x9d   : > { %v594_v39 = vpop.eup %593  ;;  %v313_v42 = vmul.f32 0.6931472, %v592_v38 }
  0x9e   : > { %v316_v43 = vmul.f32 %v594_v39, %v306_v36 }
  0x9f   : > { %v314_v46 = vsub.f32 %v311_v41, %v313_v42 }
  0xa0   : > { %v317_v44 = vsub.f32 1.0, %v316_v43 }
  0xa2   : > { %v318_v47 = vmul.f32 %v317_v44, %v317_v44 }
  0xa4   : > { %v320_v48 = vmul.f32 %v319_v45, %v318_v47 }
  0xa6   : > { %v321_v49 = vmul.f32 %v320_v48, %v314_v46 }
  0xa8   : > { %v323_v50 = vsel %vm322_vm4, %v321_v49, 0.0 }
  0xa9   : > { %324 = vadd.xlane.f32.xlu0 %v323_v50 }
 0x136   : > { %v325_v51 = vpop.xlane.xlu0 %324 }
 0x137   : > { %v326_v52 = vrot.slane %v325_v51, 4 }
 0x139   : > { %v327_v53 = vadd.f32 %v326_v52, %v325_v51 }
 0x13b   : > { %v328_v54 = vrot.slane %v327_v53, 2 }
 0x13d   : > { %v329_v55 = vadd.f32 %v328_v54, %v327_v53 }
 0x13f   : > { %v330_v56 = vrot.slane %v329_v55, 1 }
 0x141   : > { %v331_v57 = vadd.f32 %v330_v56, %v329_v55 }
 0x143   : > { %501 = vpush %v331_v57 }
 0x174   : > { %s502_s7 = spop %501 }
 0x175   : > { %v340_v61 = vstv %s502_s7 }
 0x176   : > { %v341_v62 = vsel %vm339_vm7, %v340_v61, 0.0 }
 0x177   : > { %342 = vst [vmem:[%s259_s8] sm:$0xff] %v341_v62 }
 0x178   : > { %683 = shalt.err (!%p680_p3)
}
 0x179   : > { %s684_s2 = scalar_lea.hbm %s986_s19, 128  ;;  %s688_s21 = scalar_lea.hbm %s1038_s3, 256 }
 0x17a   : > { %p685_p7 = scmp.ne.s32.totalorder %s986_s19, %s684_s2  ;;  %p689_p6 = scmp.lt.u32.totalorder %s986_s19, %s1038_s3 }
 0x17b   : > { %p690_p13 = scmp.lt.u32.totalorder %s688_s21, %s684_s2  ;;  %p692_p2 = scmp.lt.u32.totalorder %s684_s2, %s986_s19 }
 0x17c   : > { %p686_p0 = pnand %p685_p7, %p1060_p8 }
 0x17d   : > { %p691_p12 = por %p690_p13, %p689_p6 }
 0x17e   : > { %p687_p1 = pneg %p686_p0 }
 0x17f   : > { %p693_p9 = por %p692_p2, %p691_p12 }
 0x181   : > { %p694_p4 = pnand %p693_p9, %p687_p1 }
 0x183   : > { %697 = shalt.err (!%p694_p4)
}
 0x184   : > { %511 = dma.vmem_to_hbm [thread:$0]  (%p1060_p8), %s988_s11, 128, %s986_s19, %s344_s20  }
 0x185 PF: > { %s370_s9 = sand.u32 1, %s740_s12   ;;  %p1061_p10 = scmp.ne.s32.totalorder %s1050_s25, 0 }
 0x186   : > { %p1062_p5 = scmp.ge.s32.totalorder %s760_s17, 2  ;;  %s371_s4 = scalar_lea.sflag [#allocation4], %s370_s9 }
 0x188   : > { %p525_p11 = pnand %p1062_p5, %p1061_p10 }
 0x18a   : > { %735 = dma.done.wait (!%p525_p11), %s371_s4, 128  }
 0x18b   : > { %737 = vsyncadd (!%p525_p11), %s371_s4, 4294967168  ;;  %s23_s17 = sadd.s32 1, %s760_s17   ;;  %s1063_s12 = smov %s744_s13 }
 0x18c   : > { %p20_p3 = scmp.ge.s32.totalorder %s23_s17, 4   ;;  %s1064_s13 = smov %s748_s14 }
 0x18d   : > { %s1065_s14 = smov %s901_s28  ;;  %s1066_s15 = smov %s756_s16 }
 0x18e   : > { %s1067_s16 = smov %s1069_s5  ;;  %22 = sbr.rel (!%p20_p3) target bundleno = 12 (0xc), region = 98 }
 0x195   :  { %376 = vsyncpa [#allocation3], 1 }
 0x196   :  { %378 = vsyncpa [#allocation3 + $0x1], 1 }
 0x197   :  { %379 = vsyncpa [#allocation7], 1 }
 0x198   :  { %381 = vsyncpa [#allocation7 + $0x1], 1 }
 0x199   :  { %382 = vsyncpa [#allocation4], 1 }
 0x19a   :  { %384 = vsyncpa [#allocation4 + $0x1], 1 }
 0x19b   :  { %385 = vsyncpa [#allocation5], 1 }
 0x19c   :  { %387 = vsyncpa [#allocation5 + $0x1], 1 }

</bundles_post_ra>
